<compile_context>
chip_gen: v5e
topology: v5e:2x2
jax: 0.10.0
libtpu: 0.0.40
codegen_flags: <defaults>
</compile_context>

<pallas_src>
import functools

import jax
import jax.numpy as jnp
from jax import lax
from jax.experimental import pallas as pl
from jax.experimental.pallas import tpu as pltpu


def _focal_loss_kernel(x_ref, t_ref, o_ref, *, gamma, alpha, eps, batch):
    x = x_ref[...].astype(jnp.float32)       # (TB, C) logits, f32 compute
    t = t_ref[...]                           # (TB, 1) int32 labels
    tb, c = x.shape

    # Numerically stable softmax denominator (the only full-tile transcendental).
    m = jnp.max(x, axis=-1, keepdims=True)                         # (TB, 1)
    e = jnp.exp(x - m)                                             # (TB, C)
    denom = jnp.sum(e, axis=-1, keepdims=True)                     # (TB, 1)

    # Gather exp(x_t - m) for the target class via a masked row reduction
    # (avoids materializing the full softmax and B*C logs / pows / divides).
    col = lax.broadcasted_iota(jnp.int32, (tb, c), dimension=1)
    e_t = jnp.sum(jnp.where(col == t, e, 0.0), axis=-1, keepdims=True)  # (TB,1)

    # Per-row focal loss on (TB, 1) vectors only.
    p_t = e_t / denom                                              # (TB, 1)
    one_minus = 1.0 - p_t
    if gamma == 2.0:                                               # stay on VPU
        focal = one_minus * one_minus
    else:
        focal = jnp.power(one_minus, jnp.float32(gamma))
    loss_row = -alpha * focal * jnp.log(p_t + eps)                 # (TB, 1)

    # Drop (a) rows with target == 0 (reference's one_hot_key[:, 0] = 0) and
    # (b) the tail block's out-of-bounds rows (garbage logits/labels): the grid
    # is cdiv(B, TB) with no wrapper-side padding, so mask with the static B.
    row = lax.broadcasted_iota(jnp.int32, (tb, 1), dimension=0) \
        + pl.program_id(0) * tb
    keep = jnp.logical_and(t != 0, row < batch)
    loss_row = jnp.where(keep, loss_row, 0.0)

    partial = jnp.sum(loss_row).astype(jnp.float32)                # block partial
    o_ref[...] = jnp.broadcast_to(partial, o_ref.shape)


def _vmem_capacity_bytes():
    """Per-core VMEM capacity, with a conservative (v7x = 64 MiB) fallback."""
    try:
        info = pltpu.get_tpu_info()
        cap = getattr(info, "vmem_capacity_bytes", None)
        if cap:
            return int(cap)
    except Exception:
        pass
    return 64 * 1024 * 1024


def _round_up(v, m):
    return ((v + m - 1) // m) * m


def focal_loss(logits, target, *, gamma=2.0, alpha=1.0, epsilon=1e-9,
               block_rows=None):
    """Pallas implementation of FocalLoss.forward. Returns a scalar f32."""
    B, C = logits.shape
    itemsize = jnp.dtype(logits.dtype).itemsize

    # ---- Generation-aware tile sizing (bytes, not rows) -------------------
    vmem_cap = _vmem_capacity_bytes()
    # Leave ~16 MiB of physical VMEM for XLA / internal scratch; cap at 64 MiB.
    vmem_limit = min(64 * 1024 * 1024,
                     max(16 * 1024 * 1024, vmem_cap - 16 * 1024 * 1024))
    # HBM bytes of logits per grid step: ~12 MiB on v7x (3.2 TB/s needs more
    # bytes to amortize the fixed per-step cost), ~8 MiB on v5e/v6e.
    hbm_step_target = (12 if vmem_cap <= 64 * 1024 * 1024 else 8) * 1024 * 1024

    # Lane-padded per-row VMEM footprint, double-buffered:
    #   logits: ceil(C/128)*128 lanes * itemsize ; labels: 128 lanes * 4 B.
    padded_c = _round_up(C, 128)
    per_row_vmem = 2 * (padded_c * itemsize + 128 * 4)
    vmem_budget = int(0.75 * vmem_limit)        # headroom: outputs + scratch

    rows_by_vmem = max(8, vmem_budget // per_row_vmem)
    rows_by_hbm = max(8, hbm_step_target // max(1, C * itemsize))

    # Sublane granularity: 8 rows for 32-bit, 16 for 16-bit dtypes.
    sub = 8 * max(1, 4 // itemsize)
    b_up = _round_up(B, sub)
    tile_rows = min(rows_by_vmem, rows_by_hbm, b_up)
    if block_rows is not None:
        tile_rows = min(tile_rows, _round_up(int(block_rows), sub))
    tile_rows = max(sub, (tile_rows // sub) * sub)
    num_blocks = pl.cdiv(B, tile_rows)

    t2 = target.astype(jnp.int32).reshape(B, 1)

    kernel = functools.partial(
        _focal_loss_kernel,
        gamma=float(gamma), alpha=float(alpha), eps=float(epsilon), batch=B)

    partials = pl.pallas_call(
        kernel,
        out_shape=jax.ShapeDtypeStruct((num_blocks, 1, 128), jnp.float32),
        grid=(num_blocks,),
        in_specs=[
            pl.BlockSpec((tile_rows, C), lambda i: (i, 0)),   # logits tile
            pl.BlockSpec((tile_rows, 1), lambda i: (i, 0)),   # labels tile
        ],
        out_specs=pl.BlockSpec((1, 1, 128), lambda i: (i, 0, 0)),
        compiler_params=pltpu.CompilerParams(
            dimension_semantics=("parallel",),      # megacore-shardable
            vmem_limit_bytes=int(vmem_limit),
        ),
        cost_estimate=pl.CostEstimate(
            flops=int(6 * B * C),
            transcendentals=int(B * C + 2 * B),     # exp per element, log/div per row
            bytes_accessed=int(B * C * itemsize + B * 4 + num_blocks * 128 * 4),
        ),
    )(logits, t2)

    # Tiny wrapper-side reduce over per-block partial sums; mean over true B.
    return jnp.sum(partials[:, 0, 0]) / jnp.float32(B)


def _focal_loss_ref(logits, target, *, gamma=2.0, alpha=1.0, epsilon=1e-9):
    """Pure-JAX reference mirroring the PyTorch module."""
    B, C = logits.shape
    one_hot = jax.nn.one_hot(target, C, dtype=jnp.float32)
    one_hot = one_hot.at[:, 0].set(0.0)
    p = jax.nn.softmax(logits.astype(jnp.float32), axis=-1)
    loss = -alpha * one_hot * jnp.power(1.0 - p, gamma) * jnp.log(p + epsilon)
    return jnp.mean(jnp.sum(loss, axis=1))


if __name__ == "__main__":
    key = jax.random.PRNGKey(0)

    cases = [
        # (B, C, block_rows, dtype)
        (13, 32, 8, jnp.float32),      # ragged batch -> 2-step grid + in-kernel tail mask
        (64, 40, None, jnp.float32),   # non-power-of-two C, auto tile (single block)
        (24, 32, 16, jnp.bfloat16),    # bf16 on the wire, 2-step grid, ragged tail
        (8, 8, None, jnp.float32),     # tiny sanity case
    ]
    for idx, (B, C, br, dt) in enumerate(cases):
        k_x, k_t = jax.random.split(jax.random.fold_in(key, idx))
        logits = jax.random.normal(k_x, (B, C), dtype=jnp.float32).astype(dt)
        target = jax.random.randint(k_t, (B,), 0, C, dtype=jnp.int32)

        out = focal_loss(logits, target, gamma=2.0, alpha=1.0, epsilon=1e-9,
                         block_rows=br)
        out = jax.block_until_ready(out)
        ref = _focal_loss_ref(logits, target, gamma=2.0, alpha=1.0, epsilon=1e-9)
        assert jnp.allclose(out, ref, rtol=1e-5, atol=1e-6), (B, C, dt, out, ref)

    print("KERNEL_OK")
</pallas_src>

<mosaic_0001>
module attributes {stable_mosaic.version = 11 : i64} {
  func.func @_focal_loss_kernel(%arg0: i32, %arg1: memref<8x32xf32, #tpu.memory_space<vmem>>, %arg2: memref<8x1xi32, #tpu.memory_space<vmem>>, %arg3: memref<1x1x128xf32, #tpu.memory_space<vmem>>) attributes {dimension_semantics = [#tpu.dimension_semantics<parallel>], iteration_bounds = array<i64: 2>, scalar_prefetch = 0 : i64, scratch_operands = 0 : i64, tpu.core_type = #tpu.core_type<tc>, window_params = [{transform_indices = @transform_0, window_bounds = array<i64: 8, 32>}, {transform_indices = @transform_1, window_bounds = array<i64: 8, 1>}, {transform_indices = @transform_2, window_bounds = array<i64: 1, 1, 128>}]} {
    %c0 = arith.constant 0 : index
    %c0_0 = arith.constant 0 : index
    %0 = vector.load %arg1[%c0, %c0_0] : memref<8x32xf32, #tpu.memory_space<vmem>>, vector<8x32xf32>
    %c0_1 = arith.constant 0 : index
    %c0_2 = arith.constant 0 : index
    %1 = vector.load %arg2[%c0_1, %c0_2] : memref<8x1xi32, #tpu.memory_space<vmem>>, vector<8x1xi32>
    %cst = arith.constant dense<0xFF800000> : vector<8xf32>
    %2 = vector.multi_reduction <maximumf>, %0, %cst [1] : vector<8x32xf32> to vector<8xf32>
    %3 = vector.shape_cast %2 : vector<8xf32> to vector<8x1xf32>
    %4 = vector.broadcast %3 : vector<8x1xf32> to vector<8x32xf32>
    %5 = arith.subf %0, %4 : vector<8x32xf32>
    %6 = math.exp %5 : vector<8x32xf32>
    %cst_3 = arith.constant dense<0.000000e+00> : vector<8xf32>
    %7 = vector.multi_reduction <add>, %6, %cst_3 [1] : vector<8x32xf32> to vector<8xf32>
    %8 = vector.shape_cast %7 : vector<8xf32> to vector<8x1xf32>
    %9 = tpu.iota {dimensions = array<i32: 1>} : vector<8x32xi32>
    %10 = vector.broadcast %1 : vector<8x1xi32> to vector<8x32xi32>
    %11 = arith.cmpi eq, %9, %10 : vector<8x32xi32>
    %cst_4 = arith.constant 0.000000e+00 : f32
    %12 = vector.broadcast %cst_4 : f32 to vector<8x32xf32>
    %13 = arith.select %11, %6, %12 : vector<8x32xi1>, vector<8x32xf32>
    %cst_5 = arith.constant dense<0.000000e+00> : vector<8xf32>
    %14 = vector.multi_reduction <add>, %13, %cst_5 [1] : vector<8x32xf32> to vector<8xf32>
    %15 = vector.shape_cast %14 : vector<8xf32> to vector<8x1xf32>
    %16 = arith.divf %15, %8 : vector<8x1xf32>
    %cst_6 = arith.constant 1.000000e+00 : f32
    %17 = vector.broadcast %cst_6 : f32 to vector<8x1xf32>
    %18 = arith.subf %17, %16 : vector<8x1xf32>
    %19 = arith.mulf %18, %18 : vector<8x1xf32>
    %cst_7 = arith.constant -1.000000e+00 : f32
    %20 = vector.broadcast %cst_7 : f32 to vector<8x1xf32>
    %21 = arith.mulf %20, %19 : vector<8x1xf32>
    %cst_8 = arith.constant 9.99999971E-10 : f32
    %22 = vector.broadcast %cst_8 : f32 to vector<8x1xf32>
    %23 = arith.addf %16, %22 : vector<8x1xf32>
    %24 = math.log %23 : vector<8x1xf32>
    %25 = arith.mulf %21, %24 : vector<8x1xf32>
    %26 = tpu.iota {dimensions = array<i32: 0>} : vector<8x1xi32>
    %c8_i32 = arith.constant 8 : i32
    %27 = arith.muli %arg0, %c8_i32 : i32
    %28 = vector.broadcast %27 : i32 to vector<8x1xi32>
    %29 = arith.addi %26, %28 : vector<8x1xi32>
    %c0_i32 = arith.constant 0 : i32
    %30 = vector.broadcast %c0_i32 : i32 to vector<8x1xi32>
    %31 = arith.cmpi ne, %1, %30 : vector<8x1xi32>
    %c13_i32 = arith.constant 13 : i32
    %32 = vector.broadcast %c13_i32 : i32 to vector<8x1xi32>
    %33 = arith.cmpi slt, %29, %32 : vector<8x1xi32>
    %34 = arith.andi %31, %33 : vector<8x1xi1>
    %cst_9 = arith.constant 0.000000e+00 : f32
    %35 = vector.broadcast %cst_9 : f32 to vector<8x1xf32>
    %36 = arith.select %34, %25, %35 : vector<8x1xi1>, vector<8x1xf32>
    %37 = vector.shape_cast %36 : vector<8x1xf32> to vector<1x8x1xf32>
    %cst_10 = arith.constant dense<0.000000e+00> : vector<1xf32>
    %38 = vector.multi_reduction <add>, %37, %cst_10 [1, 2] : vector<1x8x1xf32> to vector<1xf32>
    %39 = vector.shape_cast %38 : vector<1xf32> to vector<1x1x1xf32>
    %40 = vector.extract %39[0, 0, 0] : f32 from vector<1x1x1xf32>
    %41 = vector.broadcast %40 : f32 to vector<1x1x128xf32>
    %c0_11 = arith.constant 0 : index
    %c0_12 = arith.constant 0 : index
    %c0_13 = arith.constant 0 : index
    %42 = vector.load %arg3[%c0_11, %c0_12, %c0_13] : memref<1x1x128xf32, #tpu.memory_space<vmem>>, vector<1x1x128xf32>
    tpu.vector_store %arg3[%c0_11, %c0_12, %c0_13], %41 {strides = array<i32>} : memref<1x1x128xf32, #tpu.memory_space<vmem>>, vector<1x1x128xf32>,
    return
  }
  func.func @transform_0(%arg0: i32) -> (i32, i32) {
    %c0_i32 = arith.constant 0 : i32
    %c0_i32_0 = arith.constant 0 : i32
    return %arg0, %c0_i32 : i32, i32
  }
  func.func @transform_1(%arg0: i32) -> (i32, i32) {
    %c0_i32 = arith.constant 0 : i32
    %c0_i32_0 = arith.constant 0 : i32
    return %arg0, %c0_i32 : i32, i32
  }
  func.func @transform_2(%arg0: i32) -> (i32, i32, i32) {
    %c0_i32 = arith.constant 0 : i32
    %c0_i32_0 = arith.constant 0 : i32
    %c0_i32_1 = arith.constant 0 : i32
    return %arg0, %c0_i32, %c0_i32_0 : i32, i32, i32
  }
}

</mosaic_0001>

<bundles_post_ra>
// kernel: tpu_custom_call.1
= control target key start
LH: loop header
LB: loop body
LE: loop exit
PB: predicated region body
PF: predicated region fallthrough
CT: control target
= control target key end

     0   :  { %7 = vsyncpa [#allocation3], 0  ;;  %s531_s0 = inlined_call_operand.vmem [shape: f32[13,32], index: 0, kind: input, shape index: {}]   ;;  %s532_s1 = inlined_call_operand.vmem [shape: s32[13,1], index: 1, kind: input, shape index: {}]   ;;  %s533_s2 = inlined_call_operand.hbm [shape: f32[2,1,128], index: 2, kind: output, shape index: {}]  }
   0x1   :  { %9 = vsyncpa [#allocation3 + $0x1], 0  ;;  %s439_s9 = smov 0   ;;  %s441_s10 = smov 0  }
   0x2   :  { %s443_s11 = smov 0   ;;  %s445_s12 = smov 0  }
   0x3 LB: > { %s460_s13 = sadd.s32 4294967295, %s421_s12   ;;  %s301_s14 = sadd.s32 4294967294, %s421_s12   ;;  %s421_s12 = sphi %s445_s12, %s539_s12   ;;  %s417_s11 = sphi %s443_s11, %s538_s11   ;;  %s413_s10 = sphi %s441_s10, %s537_s10   ;;  %s409_s9 = sphi %s439_s9, %s536_s9  }
   0x4   : > { %s464_s15 = sadd.s32 1, %s421_s12   ;;  %s74_s16 = sadd.s32 1, %s417_s11 }
   0x5   : > { %s71_s17 = ssub.s32 %s421_s12, %s464_s15  ;;  %p84_p0 = scmp.ne.s32.totalorder %s417_s11, %s413_s10 }
   0x6   : > { %p72_p1 = scmp.eq.s32.totalorder %s71_s17, 0  ;;  %p85_p2 = scmp.eq.s32.totalorder %s460_s13, 1 }
   0x7   : > { %p90_p3 = scmp.ne.s32.totalorder %s413_s10, %s409_s9  ;;  %p91_p4 = scmp.eq.s32.totalorder %s301_s14, 1 }
   0x8   : > { %s475_s18 = scalar_select %p72_p1, %s417_s11, %s74_s16  }
   0x9   : > { %p477_p5 = por %p85_p2, %p84_p0  ;;  %p481_p6 = por %p91_p4, %p90_p3 }
   0xa   : > { %p304_p7 = scmp.ge.s32.totalorder %s421_s12, 1  ;;  %p123_p8 = scmp.lt.s32.totalorder %s421_s12, 3 }
   0xc   : > { %p124_p9 = pnand %p304_p7, %p123_p8 }
   0xd   : > { %p147_p10 = scmp.lt.s32.totalorder (!%p124_p9), %s460_s13, 1  ;;  %s307_s29 = sshll.u32 (!%p124_p9), %s460_s13, 3 }
   0xe   : > { %127 = sbr.rel (%p124_p9) target bundleno = 485 (0x1e5), region = 28  ;;  %s145_s30 = sand.u32 (!%p124_p9), 1, %s413_s10  }
   0xf   : > { %s230_s5 = scalar_lea.hbm (!%p124_p9), %s533_s2, %s460_s13  ;;  %s146_s6 = scalar_lea.vmem (!%p124_p9), [#allocation2], %s145_s30 }
  0x10   : > { %s232_s7 = sshll.u32 (!%p124_p9), %s146_s6, 4  ;;  %s234_s8 = sshll.u32 (!%p124_p9), %s230_s5, 4  ;;  %s233_s7 = int_to_ptr.vmem [resolvable:$true] %s232_s7  ;;  %s235_s8 = int_to_ptr.hbm [resolvable:$true] %s234_s8 }
  0x11   : > { %s222_s16 = scalar_lea.sflag (!%p124_p9), [#allocation3], %s145_s30  ;;  %s373_s17 = sshra.s32 (!%p124_p9), %s235_s8, 4  ;;  %s374_s17 = int_to_ptr.hbm [resolvable:$true] %s373_s17 }
  0x12   : > { %p380_p0 = scmp.lt.s32.totalorder (!%p124_p9), %s374_s17, %s533_s2 }
  0x13   : > { %v423_v0 = vmov 0   ;;  %s148_s21 = scalar_select %p147_p10, %s460_s13, 1  ;;  %vm157_vm0 = vcmask 261120   ;;  %v167_v9 = vlaneseq  ;;  %v202_v29 = vstv %s307_s29 }
  0x14   : > { %352 = vset.pattern.permute.xlu0 %v423_v0  ;;  %vm208_vm9 = vcmask 7168   ;;  %s379_s13 = scalar_lea.hbm %s533_s2, 2 }
  0x15   : > { %s305_s22 = sshll.u32 %s148_s21, 3  ;;  %v168_v10 = vand.u32 127, %v167_v9  ;;  %v200_v27 = vshrl.u32 %v167_v9, 7  ;;  %s375_s21 = scalar_lea.hbm %s374_s17, 1 }
  0x16   : > { %s150_s25 = scalar_lea.vmem %s531_s0, %s305_s22  ;;  %s154_s28 = scalar_lea.vmem %s532_s1, %s305_s22 }
  0x17   : > { %v155_v1 = vld [vmem:[%s150_s25] sm:$0xff]  ;;  %v203_v31 = vadd.s32 %v202_v29, %v200_v27  ;;  %p376_p11 = scmp.ne.s32.totalorder %s374_s17, %s375_s21  ;;  %p381_p1 = scmp.lt.s32.totalorder %s379_s13, %s375_s21 }
  0x18   : > { %v158_v2 = vsel %vm157_vm0, %v155_v1, -inf  ;;  %v156_v3 = vld [vmem:[%s154_s28] sm:$0xff] }
  0x19   : > { %159 = vmax.xlane.f32.xlu0 %v158_v2  ;;  %vm204_vm6 = vcmp.ne.s32.totalorder %v156_v3, 0  ;;  %vm205_vm7 = vcmp.lt.s32.totalorder %v203_v31, 13  ;;  %p377_p12 = pnand %p376_p11, %p477_p5  ;;  %p382_p2 = por %p381_p1, %p380_p0 }
  0x1a   : > { %vm206_vm8 = vmand %vm204_vm6, %vm205_vm7 }
  0x1b   : > { %p378_p13 = pneg %p377_p12 }
  0x1d   : > { %p383_p3 = pnand %p382_p2, %p378_p13 }
  0x2d   : > { %170 = vperm.xlu0 %352, %v156_v3  }
  0x8c   : > { %v160_v4 = vpop.xlane.xlu0 %159 }
  0x8d   : > { %v161_v5 = vsub.f32 %v155_v1, %v160_v4 }
  0x8f   : > { %v162_v6 = vmul.f32 1.442695, %v161_v5 }
  0x91   : > { %353 = vpow2.f32 %v162_v6 }
  0x97   : > { %v354_v7 = vpop.eup %353 }
  0x98   : > { %v164_v8 = vsel %vm157_vm0, %v354_v7, 0.0 }
  0x99   : > { %165 = vadd.xlane.f32.xlu1 %v164_v8 }
  0x9f   : > { %v171_v11 = vpop.permute.xlu0 %170 }
  0xa0   : > { %vm172_vm1 = vcmp.eq.s32.totalorder %v168_v10, %v171_v11 }
  0xa1   : > { %v173_v12 = vsel %vm172_vm1, %v354_v7, 0.0 }
  0xa2   : > { %v174_v13 = vsel %vm157_vm0, %v173_v12, 0.0 }
  0xa3   : > { %175 = vadd.xlane.f32.xlu1 %v174_v13 }
 0x10c   : > { %v166_v14 = vpop.xlane.xlu1 %165 }
 0x10d   : > { %355 = vrcp.f32 %v166_v14  ;;  %v188_v18 = vand.u32 2147483648, %v166_v14  ;;  %v186_v20 = vand.u32 2147483647, %v166_v14  ;;  %vm182_vm3 = vweird.f32 %v166_v14 }
 0x10f   : > { %v189_v22 = vor.u32 1.1754944e-38, %v188_v18  ;;  %vm187_vm5 = vcmp.eq.f32.partialorder %v186_v20, 8.507059e+37 }
 0x113   : > { %v356_v15 = vpop.eup %355 }
 0x114   : > { %v178_v16 = vmul.f32 %v356_v15, %v166_v14  ;;  %vm183_vm2 = vweird.f32 %v356_v15 }
 0x115   : > { %vm184_vm4 = vmor %vm182_vm3, %vm183_vm2 }
 0x116   : > { %v179_v17 = vsub.f32 1.0, %v178_v16  ;;  %v176_v25 = vpop.xlane.xlu1 %175 }
 0x118   : > { %v180_v19 = vmul.f32 %v356_v15, %v179_v17 }
 0x11a   : > { %v181_v21 = vadd.f32 %v356_v15, %v180_v19 }
 0x11c   : > { %v185_v23 = vsel %vm184_vm4, %v356_v15, %v181_v21 }
 0x11d   : > { %v190_v24 = vsel %vm187_vm5, %v189_v22, %v185_v23 }
 0x11e   : > { %v191_v26 = vmul.f32 %v190_v24, %v176_v25 }
 0x120   : > { %v195_v28 = vadd.f32 1e-09, %v191_v26  ;;  %v192_v30 = vsub.f32 1.0, %v191_v26 }
 0x122   : > { %357 = vlog2.f32 %v195_v28  ;;  %v193_v32 = vmul.f32 %v192_v30, %v192_v30 }
 0x124   : > { %v194_v34 = vmul.f32 -1.0, %v193_v32 }
 0x128   : > { %v358_v33 = vpop.eup %357 }
 0x129   : > { %v197_v35 = vmul.f32 0.6931472, %v358_v33 }
 0x12b   : > { %v198_v36 = vmul.f32 %v197_v35, %v194_v34 }
 0x12d   : > { %v207_v37 = vsel %vm206_vm8, %v198_v36, 0.0 }
 0x12e   : > { %v209_v38 = vsel %vm208_vm9, %v207_v37, 0.0 }
 0x12f   : > { %210 = vadd.xlane.f32.xlu2 %v209_v38 }
 0x1a2   : > { %v211_v39 = vpop.xlane.xlu2 %210 }
 0x1a3   : > { %v212_v40 = vrot.slane %v211_v39, 4 }
 0x1a5   : > { %v213_v41 = vadd.f32 %v212_v40, %v211_v39 }
 0x1a7   : > { %v214_v42 = vrot.slane %v213_v41, 2 }
 0x1a9   : > { %v215_v43 = vadd.f32 %v214_v42, %v213_v41 }
 0x1ab   : > { %v216_v44 = vrot.slane %v215_v43, 1 }
 0x1ad   : > { %v217_v45 = vadd.f32 %v216_v44, %v215_v43 }
 0x1af   : > { %310 = vpush %v217_v45 }
 0x1e0   : > { %s311_s14 = spop %310 }
 0x1e1   : > { %v219_v46 = vstv %s311_s14 }
 0x1e2   : > { %220 = vst [vmem:[%s146_s6] sm:$0x1] %v219_v46 }
 0x1e3   : > { %386 = shalt.err (!%p383_p3)
}
 0x1e4   : > { %312 = dma.vmem_to_hbm [thread:$0]  (%p477_p5), %s233_s7, 16, %s235_s8, %s222_s16  }
 0x1e5 PF: > { %p318_p4 = scmp.ge.s32.totalorder %s421_s12, 2  ;;  %s246_s26 = sand.u32 1, %s409_s9  }
 0x1e6   : > { %s247_s27 = scalar_lea.sflag [#allocation3], %s246_s26 }
 0x1e7   : > { %p315_p7 = pnand %p318_p4, %p481_p6 }
 0x1e9   : > { %p316_p8 = pneg %p315_p7 }
 0x1eb   : > { %404 = dma.done.wait (%p316_p8), %s247_s27, 16  }
 0x1ec   : > { %406 = vsyncadd (%p316_p8), %s247_s27, 4294967280  ;;  %p12_p9 = scmp.ge.s32.totalorder %s464_s15, 4   ;;  %s536_s9 = smov %s413_s10 }
 0x1ed   : > { %s537_s10 = smov %s417_s11  ;;  %s538_s11 = smov %s475_s18 }
 0x1ee   : > { %s539_s12 = smov %s464_s15  ;;  %14 = sbr.rel (!%p12_p9) target bundleno = 3 (0x3), region = 66 }
 0x1f3   :  { %252 = vsyncpa [#allocation3], 1 }
 0x1f4   :  { %254 = vsyncpa [#allocation3 + $0x1], 1 }

</bundles_post_ra>
